<compile_context>
chip_gen: v6e
topology: v6e:2x2x1
jax: 0.10.0
libtpu: 0.0.40
codegen_flags: <defaults>
</compile_context>

<pallas_src>
import jax
import jax.numpy as jnp
from jax.experimental import pallas as pl
from jax.experimental.pallas import tpu as pltpu

NEG_SLOPE = 0.01  # F.leaky_relu default

_VMEM_LIMIT_BYTES = 48 * 1024 * 1024   # > 16/32 MiB scoped defaults, < v7x 64 MiB physical
_TILE_BUDGET_BYTES = 16 * 1024 * 1024  # target pipelined per-step VMEM footprint


def _leaky_relu(x):
    return jnp.where(x >= 0, x, NEG_SLOPE * x)


def attention_kernel(x_ref, w1t_ref, w2t_ref, w3t_ref, o_ref):
    # x_ref:   (C, tm)      channels-first pixel tile (pixels on lanes)
    # w1t_ref: (C//2, C)    transposed 1x1-conv weights (grid-invariant)
    # w2t_ref: (C//4, C//2)
    # w3t_ref: (1, C//4)
    # o_ref:   (1, tm)      lane-dense attention-map tile
    h = jnp.dot(w1t_ref[...], x_ref[...], preferred_element_type=jnp.float32)
    h = _leaky_relu(h)
    h = jnp.dot(w2t_ref[...], h, preferred_element_type=jnp.float32)
    h = _leaky_relu(h)
    h = jnp.dot(w3t_ref[...], h, preferred_element_type=jnp.float32)
    o_ref[...] = jax.nn.sigmoid(h).astype(o_ref.dtype)


def _choose_pixel_tile(HW, C, in_itemsize, N, budget_bytes):
    """Largest lane-aligned pixel tile whose pipelined VMEM footprint fits the
    budget, preferring a tile that divides HW (no ragged tail, no padding)."""
    bytes_per_px = (2 * C * in_itemsize            # input, double-buffered
                    + 2 * in_itemsize              # output, double-buffered
                    + 4 * (C // 2 + C // 4 + 1))   # f32 intermediates h1/h2/s
    tm = max(128, (budget_bytes // bytes_per_px) // 128 * 128)
    if N == 1 and HW > 2 * 128:
        # Keep at least two pixel tiles so both v7x TensorCores get work.
        tm = min(tm, pl.cdiv(pl.cdiv(HW, 2), 128) * 128)
    if tm >= HW:
        return HW                                  # single full-axis tile
    # Prefer an exact divisor of HW among multiples of 128 (not too small).
    for t in range(tm, max(127, tm // 2 - 1), -128):
        if HW % t == 0:
            return t
    return tm                                      # ragged last block (masked writeback)


def attention_forward(x_nchw, w1, w2, w3, *, compute_dtype=None):
    """x_nchw: (N, C, H, W).  w1: (C, C//2), w2: (C//2, C//4), w3: (C//4, 1)
    stored as (in_ch, out_ch) matmul matrices (== bias-free 1x1 convs).
    Returns the (N, 1, H, W) sigmoid attention map, matching PyTorch.
    Set compute_dtype=jnp.bfloat16 to halve input bandwidth (accuracy tradeoff)."""
    N, C, H, W = x_nchw.shape
    C2, C4 = w1.shape[1], w2.shape[1]
    HW = H * W
    out_dtype = x_nchw.dtype

    x = x_nchw.reshape(N, C, HW)                   # contiguous, no transpose
    w1t, w2t, w3t = w1.T, w2.T, w3.T               # tiny, one-time

    if compute_dtype is not None:                  # opt-in bandwidth saver
        x = x.astype(compute_dtype)
        w1t = w1t.astype(compute_dtype)
        w2t = w2t.astype(compute_dtype)
        w3t = w3t.astype(compute_dtype)

    itemsize = jnp.dtype(x.dtype).itemsize
    tm = _choose_pixel_tile(HW, C, itemsize, N, _TILE_BUDGET_BYTES)
    n_tiles = pl.cdiv(HW, tm)
    grid = (N, n_tiles)

    # Deeper input buffering only pays off when the tile is forced small.
    if tm <= 512 and n_tiles >= 4:
        x_spec = pl.BlockSpec((None, C, tm), lambda n, j: (n, 0, j),
                              pipeline_mode=pl.Buffered(3))
    else:
        x_spec = pl.BlockSpec((None, C, tm), lambda n, j: (n, 0, j))

    cost = pl.CostEstimate(
        flops=2 * N * HW * (C * C2 + C2 * C4 + C4),
        transcendentals=N * HW,  # sigmoid
        bytes_accessed=(N * HW * C * itemsize                       # activations in
                        + N * HW * jnp.dtype(out_dtype).itemsize    # attention map out
                        + (C * C2 + C2 * C4 + C4) * itemsize),      # weights
    )

    out = pl.pallas_call(
        attention_kernel,
        out_shape=jax.ShapeDtypeStruct((N, 1, HW), out_dtype),
        grid_spec=pltpu.PrefetchScalarGridSpec(
            num_scalar_prefetch=0,
            grid=grid,
            in_specs=[
                x_spec,
                pl.BlockSpec(w1t.shape, lambda n, j: (0, 0)),
                pl.BlockSpec(w2t.shape, lambda n, j: (0, 0)),
                pl.BlockSpec(w3t.shape, lambda n, j: (0, 0)),
            ],
            out_specs=pl.BlockSpec((None, 1, tm), lambda n, j: (n, 0, j)),
        ),
        compiler_params=pltpu.CompilerParams(
            dimension_semantics=("parallel", "parallel"),
            vmem_limit_bytes=_VMEM_LIMIT_BYTES),
        cost_estimate=cost,
    )(x, w1t, w2t, w3t)

    return out.reshape(N, 1, H, W)


def init_weights(key, in_ch, dtype=jnp.float32):
    """Deterministic init mimicking nn.Conv2d (kaiming-uniform-ish), bias=False.
    PyTorch conv weights are (out_ch, in_ch, 1, 1); we store the equivalent
    (in_ch, out_ch) matmul matrices."""
    c2, c4 = in_ch // 2, in_ch // 4
    k1, k2, k3 = jax.random.split(key, 3)

    def u(k, fan_in, shape):
        bound = (1.0 / fan_in) ** 0.5
        return jax.random.uniform(k, shape, dtype, minval=-bound, maxval=bound)

    w1 = u(k1, in_ch, (in_ch, c2))   # first_conv
    w2 = u(k2, c2, (c2, c4))         # second_conv
    w3 = u(k3, c4, (c4, 1))          # attention_weights
    return w1, w2, w3


def reference_forward(x_nchw, w1, w2, w3):
    """Pure-JAX reference (same math, no Pallas)."""
    N, C, H, W = x_nchw.shape
    x = jnp.transpose(x_nchw, (0, 2, 3, 1)).reshape(-1, C).astype(jnp.float32)
    h = _leaky_relu(x @ w1.astype(jnp.float32))
    h = _leaky_relu(h @ w2.astype(jnp.float32))
    h = jax.nn.sigmoid(h @ w3.astype(jnp.float32)).astype(x_nchw.dtype)
    return jnp.transpose(h.reshape(N, H, W, 1), (0, 3, 1, 2))


if __name__ == "__main__":
    key = jax.random.PRNGKey(0)
    kx, kw = jax.random.split(key)

    N, C, H, W = 2, 16, 16, 16  # in_ch=16 -> 8 -> 4 -> 1
    x = jax.random.normal(kx, (N, C, H, W), dtype=jnp.float32)
    w1, w2, w3 = init_weights(kw, C)

    out = attention_forward(x, w1, w2, w3)
    out = jax.block_until_ready(out)

    ref = reference_forward(x, w1, w2, w3)
    assert out.shape == (N, 1, H, W), out.shape
    assert jnp.allclose(out, ref, atol=1e-5, rtol=1e-5), \
        float(jnp.max(jnp.abs(out - ref)))

    print("KERNEL_OK")
</pallas_src>

<mosaic_0001>
module attributes {stable_mosaic.version = 11 : i64} {
  func.func @attention_kernel(%arg0: i32, %arg1: i32, %arg2: memref<1x16x256xf32, #tpu.memory_space<vmem>>, %arg3: memref<8x16xf32, #tpu.memory_space<vmem>>, %arg4: memref<4x8xf32, #tpu.memory_space<vmem>>, %arg5: memref<1x4xf32, #tpu.memory_space<vmem>>, %arg6: memref<1x1x256xf32, #tpu.memory_space<vmem>>) attributes {dimension_semantics = [#tpu.dimension_semantics<parallel>, #tpu.dimension_semantics<parallel>], iteration_bounds = array<i64: 2, 1>, scalar_prefetch = 0 : i64, scratch_operands = 0 : i64, tpu.core_type = #tpu.core_type<tc>, window_params = [{transform_indices = @transform_0, window_bounds = array<i64: 1, 16, 256>}, {pipeline_mode = #tpu.pipeline_mode<synchronous>, transform_indices = @transform_1, window_bounds = array<i64: 8, 16>}, {pipeline_mode = #tpu.pipeline_mode<synchronous>, transform_indices = @transform_2, window_bounds = array<i64: 4, 8>}, {pipeline_mode = #tpu.pipeline_mode<synchronous>, transform_indices = @transform_3, window_bounds = array<i64: 1, 4>}, {transform_indices = @transform_4, window_bounds = array<i64: 1, 1, 256>}]} {
    %c0 = arith.constant 0 : index
    %c0_0 = arith.constant 0 : index
    %0 = vector.load %arg3[%c0, %c0_0] : memref<8x16xf32, #tpu.memory_space<vmem>>, vector<8x16xf32>
    %c0_1 = arith.constant 0 : index
    %c0_2 = arith.constant 0 : index
    %c0_3 = arith.constant 0 : index
    %1 = vector.load %arg2[%c0_1, %c0_2, %c0_3] : memref<1x16x256xf32, #tpu.memory_space<vmem>>, vector<1x16x256xf32>
    %2 = vector.shape_cast %1 : vector<1x16x256xf32> to vector<16x256xf32>
    %cst = arith.constant dense<0.000000e+00> : vector<8x256xf32>
    %3 = tpu.matmul %0, %2, %cst {dimension_numbers = #tpu.dot_dimension_numbers<[1], [0], [0], [1], [0, 0, 1, 1], [], []>} : vector<8x16xf32>, vector<16x256xf32>, vector<8x256xf32> -> vector<8x256xf32>
    %cst_4 = arith.constant 0.000000e+00 : f32
    %4 = vector.broadcast %cst_4 : f32 to vector<8x256xf32>
    %5 = arith.cmpf oge, %3, %4 : vector<8x256xf32>
    %cst_5 = arith.constant 0.00999999977 : f32
    %6 = vector.broadcast %cst_5 : f32 to vector<8x256xf32>
    %7 = arith.mulf %6, %3 : vector<8x256xf32>
    %8 = arith.select %5, %3, %7 : vector<8x256xi1>, vector<8x256xf32>
    %c0_6 = arith.constant 0 : index
    %c0_7 = arith.constant 0 : index
    %9 = vector.load %arg4[%c0_6, %c0_7] : memref<4x8xf32, #tpu.memory_space<vmem>>, vector<4x8xf32>
    %cst_8 = arith.constant dense<0.000000e+00> : vector<4x256xf32>
    %10 = tpu.matmul %9, %8, %cst_8 {dimension_numbers = #tpu.dot_dimension_numbers<[1], [0], [0], [1], [0, 0, 1, 1], [], []>} : vector<4x8xf32>, vector<8x256xf32>, vector<4x256xf32> -> vector<4x256xf32>
    %cst_9 = arith.constant 0.000000e+00 : f32
    %11 = vector.broadcast %cst_9 : f32 to vector<4x256xf32>
    %12 = arith.cmpf oge, %10, %11 : vector<4x256xf32>
    %cst_10 = arith.constant 0.00999999977 : f32
    %13 = vector.broadcast %cst_10 : f32 to vector<4x256xf32>
    %14 = arith.mulf %13, %10 : vector<4x256xf32>
    %15 = arith.select %12, %10, %14 : vector<4x256xi1>, vector<4x256xf32>
    %c0_11 = arith.constant 0 : index
    %c0_12 = arith.constant 0 : index
    %16 = vector.load %arg5[%c0_11, %c0_12] : memref<1x4xf32, #tpu.memory_space<vmem>>, vector<1x4xf32>
    %cst_13 = arith.constant dense<0.000000e+00> : vector<1x256xf32>
    %17 = tpu.matmul %16, %15, %cst_13 {dimension_numbers = #tpu.dot_dimension_numbers<[1], [0], [0], [1], [0, 0, 1, 1], [], []>} : vector<1x4xf32>, vector<4x256xf32>, vector<1x256xf32> -> vector<1x256xf32>
    %18 = arith.negf %17 : vector<1x256xf32>
    %19 = math.exp %18 : vector<1x256xf32>
    %cst_14 = arith.constant 1.000000e+00 : f32
    %20 = vector.broadcast %cst_14 : f32 to vector<1x256xf32>
    %21 = arith.addf %20, %19 : vector<1x256xf32>
    %22 = arith.divf %20, %21 : vector<1x256xf32>
    %c0_15 = arith.constant 0 : index
    %c0_16 = arith.constant 0 : index
    %c0_17 = arith.constant 0 : index
    %23 = vector.load %arg6[%c0_15, %c0_16, %c0_17] : memref<1x1x256xf32, #tpu.memory_space<vmem>>, vector<1x1x256xf32>
    %24 = vector.shape_cast %23 : vector<1x1x256xf32> to vector<1x256xf32>
    %25 = vector.shape_cast %22 : vector<1x256xf32> to vector<1x1x256xf32>
    tpu.vector_store %arg6[%c0_15, %c0_16, %c0_17], %25 {strides = array<i32>} : memref<1x1x256xf32, #tpu.memory_space<vmem>>, vector<1x1x256xf32>,
    return
  }
  func.func @transform_0(%arg0: i32, %arg1: i32) -> (i32, i32, i32) {
    %c0_i32 = arith.constant 0 : i32
    %c0_i32_0 = arith.constant 0 : i32
    return %arg0, %c0_i32, %arg1 : i32, i32, i32
  }
  func.func @transform_1(%arg0: i32, %arg1: i32) -> (i32, i32) {
    %c0_i32 = arith.constant 0 : i32
    %c0_i32_0 = arith.constant 0 : i32
    %c0_i32_1 = arith.constant 0 : i32
    return %c0_i32, %c0_i32_0 : i32, i32
  }
  func.func @transform_2(%arg0: i32, %arg1: i32) -> (i32, i32) {
    %c0_i32 = arith.constant 0 : i32
    %c0_i32_0 = arith.constant 0 : i32
    %c0_i32_1 = arith.constant 0 : i32
    return %c0_i32, %c0_i32_0 : i32, i32
  }
  func.func @transform_3(%arg0: i32, %arg1: i32) -> (i32, i32) {
    %c0_i32 = arith.constant 0 : i32
    %c0_i32_0 = arith.constant 0 : i32
    %c0_i32_1 = arith.constant 0 : i32
    return %c0_i32, %c0_i32_0 : i32, i32
  }
  func.func @transform_4(%arg0: i32, %arg1: i32) -> (i32, i32, i32) {
    %c0_i32 = arith.constant 0 : i32
    %c0_i32_0 = arith.constant 0 : i32
    return %arg0, %c0_i32, %arg1 : i32, i32, i32
  }
}

</mosaic_0001>

<bundles_post_ra>
// kernel: tpu_custom_call.1
= control target key start
LH: loop header
LB: loop body
LE: loop exit
PB: predicated region body
PF: predicated region fallthrough
CT: control target
= control target key end

     0   :  { %s1167_s0 = inlined_call_operand.hbm [shape: f32[2,16,256], index: 0, kind: input, shape index: {}]   ;;  %s1168_s1 = inlined_call_operand.hbm [shape: f32[8,16], index: 1, kind: input, shape index: {}]   ;;  %s1169_s2 = inlined_call_operand.hbm [shape: f32[4,8], index: 2, kind: input, shape index: {}]   ;;  %s1170_s3 = inlined_call_operand.vmem [shape: f32[1,4], index: 3, kind: input, shape index: {}]   ;;  %s1171_s4 = inlined_call_operand.hbm [shape: f32[2,1,256], index: 4, kind: output, shape index: {}]  }
   0x1   :  { %1178 = sst [smem:[#allocation12_spill]] %s1168_s1 }
   0x2   :  { %1179 = sst [smem:[#allocation13_spill]] %s1169_s2 }
   0x3   :  { %9 = vsyncpa [#allocation3], 0 }
   0x4   :  { %11 = vsyncpa [#allocation3 + $0x1], 0 }
   0x5   :  { %12 = vsyncpa [#allocation6], 0 }
   0x6   :  { %13 = vsyncpa [#allocation4], 0 }
   0x7   :  { %15 = vsyncpa [#allocation4 + $0x1], 0  ;;  %s989_s15 = smov 0   ;;  %s991_s16 = smov 0  }
   0x8   :  { %s993_s17 = smov 0   ;;  %s995_s18 = smov 0  }
   0x9   :  { %s997_s19 = smov 0   ;;  %s999_s20 = smov 0  }
   0xa LB: > { %s667_s21 = sadd.s32 4294967295, %s954_s20   ;;  %s668_s22 = sadd.s32 4294967294, %s954_s20   ;;  %s954_s20 = sphi %s999_s20, %s21_s20   ;;  %s950_s19 = sphi %s997_s19, %s1201_s19   ;;  %s946_s18 = sphi %s995_s18, %s1200_s18   ;;  %s942_s17 = sphi %s993_s17, %s1199_s17   ;;  %s938_s16 = sphi %s991_s16, %s1198_s16   ;;  %s934_s15 = sphi %s989_s15, %s1197_s15  }
   0xb   : > { %s42_s23 = sadd.s32 1, %s942_s17  ;;  %p49_p0 = scmp.ne.s32.totalorder %s942_s17, %s938_s16 }
   0xc   : > { %p50_p1 = scmp.eq.s32.totalorder %s954_s20, 0  ;;  %p55_p2 = scmp.ne.s32.totalorder %s938_s16, %s934_s15 }
   0xd   : > { %p1027_p3 = scmp.eq.s32.totalorder %s667_s21, 0  ;;  %p144_p4 = scmp.eq.s32.totalorder %s667_s21, 1 }
   0xe   : > { %p1031_p5 = por %p50_p1, %p49_p0  ;;  %p150_p6 = scmp.eq.s32.totalorder %s668_s22, 1 }
   0xf   : > { %s1180_s24 = scalar_select %p1027_p3, 1, 0 }
  0x10   : > { %p1037_p7 = por %p1027_p3, %p55_p2  ;;  %p1041_p8 = por %p144_p4, %p49_p0 }
  0x11   : > { %p1045_p9 = por %p150_p6, %p55_p2  ;;  %p669_p10 = scmp.ge.s32.totalorder %s954_s20, 1 }
  0x12   : > { %s1182_s26 = scalar_select %p1037_p7, 1, 0 }
  0x13   : > { %s1183_s27 = scalar_select %p1041_p8, 1, 0 }
  0x14   : > { %s1184_s28 = scalar_select %p1045_p9, 1, 0 }
  0x15   : > { %p157_p11 = scmp.lt.s32.totalorder %s954_s20, 3  ;;  %s956_s30 = smov [#allocation5]  }
  0x16   : > { %s170_s5 = sshll.u32 %s956_s30, 4  ;;  %p724_p1 = scmp.lt.s32.totalorder %s954_s20, 2  ;;  %s171_s5 = int_to_ptr.vmem [resolvable:$true] %s170_s5 }
  0x17   : > { %p1052_p13 = pnand %p669_p10, %p157_p11  ;;  %s957_s7 = smov [#allocation7]  }
  0x18   : > { %p1061_p4 = pnand %p724_p1, %p1031_p5  ;;  %s181_s8 = sshll.u32 %s957_s7, 4  ;;  %s182_s8 = int_to_ptr.vmem [resolvable:$true] %s181_s8 }
  0x19   : > { %s1185_s29 = scalar_select %p1052_p13, 1, 0 }
  0x1a   : > { %p707_p0 = pneg %p1052_p13  ;;  %s801_s10 = scalar_lea.vmem %s171_s5, 128 }
  0x1b   : > { %s1186_s6 = scalar_select %p1061_p4, 1, 0 }
  0x1c   : > { %p1067_p2 = pnand %p707_p0, %p1027_p3  ;;  %p802_p10 = scmp.ne.s32.totalorder %s171_s5, %s801_s10 }
  0x1d   : > { %p809_p1 = scmp.lt.s32.totalorder %s171_s5, %s171_s5  ;;  %p810_p12 = scmp.lt.s32.totalorder %s801_s10, %s801_s10 }
  0x1e   : > { %p792_p6 = pneg %p1067_p2 }
  0x1f   : > { %p811_p9 = por %p810_p12, %p809_p1 }
  0x20   : > { %p804_p5 = pnand %p802_p10, %p792_p6 }
  0x22   : > { %p805_p11 = pneg %p804_p5 }
  0x24   : > { %p812_p8 = pnand %p811_p9, %p805_p11 }
  0x26   : > { %815 = shalt.err (!%p812_p8)
}
  0x27   : > { %s1188_s1 = sld [smem:[#allocation12_spill]]  ;;  %s827_s13 = scalar_lea.vmem %s182_s8, 64 }
  0x28   : > { %p828_p0 = scmp.ne.s32.totalorder %s182_s8, %s827_s13  ;;  %p835_p10 = scmp.lt.s32.totalorder %s182_s8, %s182_s8 }
  0x29   : > { %p836_p5 = scmp.lt.s32.totalorder %s827_s13, %s827_s13 }
  0x2a   : > { %p830_p3 = pnand %p828_p0, %p792_p6 }
  0x2b   : > { %p837_p13 = por %p836_p5, %p835_p10 }
  0x2c   : > { %p831_p7 = pneg %p830_p3 }
  0x2d   : > { %710 = dma.hbm_to_vmem [thread:$0]  (!%p1067_p2), %s1188_s1, 128, %s171_s5, [#allocation6]  }
  0x2e   : > { %p838_p4 = pnand %p837_p13, %p831_p7 }
  0x30   : > { %841 = shalt.err (!%p838_p4)
}
  0x31   : > { %s1189_s2 = sld [smem:[#allocation13_spill]]  ;;  %s33_s22 = sadd.s32 1, %s950_s19 }
  0x32   : > { %s195_s25 = sand.u32 1, %s942_s17   ;;  %p35_p3 = scmp.ge.s32.totalorder %s33_s22, 2 }
  0x33   : > { %s673_s30 = sshll.u32 %s195_s25, 5  ;;  %s693_s5 = sshll.u32 %s950_s19, 9 }
  0x34   : > { %s1203_s22 = smov (%p35_p3, %s33_s22), 0  ;;  %s207_s10 = scalar_lea.hbm %s1167_s0, %s693_s5 }
  0x35   : > { %s37_s11 = ssub.s32 %s950_s19, %s1203_s22  ;;  %s199_s12 = scalar_lea.vmem [#allocation2], %s673_s30 }
  0x36   : > { %s208_s13 = sshll.u32 %s199_s12, 4  ;;  %p40_p7 = scmp.eq.s32.totalorder %s37_s11, 0  ;;  %s209_s13 = int_to_ptr.vmem [resolvable:$true] %s208_s13 }
  0x37   : > { %713 = dma.hbm_to_vmem [thread:$0]  (!%p1067_p2), %s1189_s2, 64, %s182_s8, [#allocation6]  }
  0x38   : > { %s1102_s14 = scalar_select %p40_p7, %s942_s17, %s42_s23  }
  0x39   : > { %s196_s8 = scalar_lea.sflag [#allocation3], %s195_s25  ;;  %p1190_p8 = scmp.ne.s32.totalorder %s1186_s6, 0 }
  0x3a   : > { %s855_s21 = scalar_lea.vmem %s209_s13, 512  ;;  %s958_s1 = smov [#allocation2]  }
  0x3b   : > { %p844_p9 = pneg %p1190_p8  ;;  %p856_p12 = scmp.ne.s32.totalorder %s209_s13, %s855_s21 }
  0x3c   : > { %s860_s2 = sshll.u32 %s958_s1, 4  ;;  %s861_s2 = int_to_ptr.vmem [resolvable:$false] %s860_s2 }
  0x3d   : > { %p858_p13 = pnand %p856_p12, %p844_p9  ;;  %s862_s7 = scalar_lea.vmem %s861_s2, 1024 }
  0x3e   : > { %p863_p2 = scmp.lt.s32.totalorder %s209_s13, %s861_s2  ;;  %p864_p6 = scmp.lt.s32.totalorder %s862_s7, %s855_s21 }
  0x3f   : > { %p859_p4 = pneg %p858_p13 }
  0x40   : > { %p865_p11 = por %p864_p6, %p863_p2 }
  0x42   : > { %p866_p1 = pnand %p865_p11, %p859_p4 }
  0x44   : > { %869 = shalt.err (!%p866_p1)
}
  0x45   : > { %s959_s30 = smov 256   ;;  %s960_s23 = smov 16  }
  0x46   : > { %717 = dma.hbm_to_vmem [thread:$0]  (!%p1190_p8), %s207_s10, 512, %s209_s13, %s196_s8, %s959_s30, %s959_s30, %s960_s23  }
  0x47   : > { %p1191_p0 = scmp.ne.s32.totalorder %s1185_s29, 0 }
  0x48   : > { %s1111_s25 = sand.u32 (!%p1191_p0), 1, %s938_s16   ;;  %p1192_p10 = scmp.ne.s32.totalorder (!%p1191_p0), %s1182_s26, 0 }
  0x49   : > { %220 = sbr.rel (%p1191_p0) target bundleno = 734 (0x2de), region = 36  ;;  %s677_s1 = sshll.u32 (!%p1191_p0), %s1111_s25, 5 }
  0x4a   : > { %s223_s2 = scalar_lea.sflag (!%p1191_p0), [#allocation3], %s1111_s25  ;;  %s226_s5 = scalar_lea.vmem (!%p1191_p0), [#allocation2], %s677_s1 }
  0x4e   : > { %921 = dma.done.wait (%p1192_p10), %s223_s2, 512  }
  0x4f   : > { %923 = vsyncadd (%p1192_p10), %s223_s2, 4294966784  ;;  %p1193_p5 = scmp.ne.s32.totalorder %s1180_s24, 0 }
  0x51   : > { %925 = dma.done.wait (%p1193_p5), [#allocation6], 192  }
  0x52   : > { %927 = vsyncadd (%p1193_p5), [#allocation6], 4294967104  ;;  %v961_v0 = vmov 0.0   ;;  %v265_v1 = vld [vmem:[%s226_s5 + $0x18] sm:$0xff]  ;;  %v264_v2 = vld [vmem:[%s226_s5 + $0x10] sm:$0xff]  ;;  %vm266_vm0 = vcmask 130048   ;;  %v530_v30 = vlaneseq }
  0x53   : > { %334 = vmatprep.mubr.f32.mxu0 %v961_v0  ;;  %416 = vmatprep.mubr.f32.mxu1 %v961_v0  ;;  %v263_v3 = vld [vmem:[%s226_s5 + $0x8] sm:$0xff]  ;;  %v262_v4 = vld [vmem:[%s226_s5] sm:$0xff]  ;;  %vm348_vm3 = vcmask 64512   ;;  %vm434_vm6 = vcmask 1043456   ;;  %vm430_vm7 = vcmask 31744   ;;  %s680_s29 = sshll.u32 %s1111_s25, 1 }
  0x54   : > { %298 = vmatprep.subr.mxu0 %v265_v1  ;;  %v261_v5 = vld [vmem:[#allocation5] sm:$0xff]  ;;  %v347_v11 = vld [vmem:[#allocation7] sm:$0xf]  ;;  %v962_v28 = vmov 1966171168   ;;  %v531_v32 = vshrl.u32 %v530_v30, 7 }
  0x55   : > { %299 = vmatpush1.msra.mxu0 %v264_v2  ;;  %v429_v18 = vld [vmem:[%s1170_s3] sm:$0x1]  ;;  %v528_v29 = vunpack.c.l.s4 %v962_v28  ;;  %s694_s6 = sshll.u32 %s946_s18, 5  ;;  %s258_s9 = scalar_lea.vmem [#allocation8], %s680_s29  ;;  %vm544_vm8 = vcmp.lt.s32.totalorder %v530_v30, 256 }
  0x56   : > { %300 = vmatprep.subr.mxu0 %v263_v3  ;;  %s564_s10 = sshll.u32 %s258_s9, 4  ;;  %s562_s13 = scalar_lea.hbm %s1171_s4, %s694_s6  ;;  %s565_s10 = int_to_ptr.vmem [resolvable:$true] %s564_s10 }
  0x57   : > { %301 = vmatpush1.msra.mxu0 %v262_v4  ;;  %v529_v31 = vunpack.c.0.s8 %v528_v29  ;;  %s548_s8 = scalar_lea.sflag [#allocation4], %s1111_s25  ;;  %s870_s21 = scalar_lea.vmem %s565_s10, 32 }
  0x58   : > { %681 = vmatmul.mubr.msk.f32.vlgmr.msra.gmra.mxu0 %vm266_vm0, %v261_v5  ;;  %p871_p3 = scmp.ne.s32.totalorder %s565_s10, %s870_s21  ;;  %p1194_p7 = scmp.ne.s32.totalorder %s1183_s27, 0 }
  0x59   : > { %v532_v34 = vsub.s32 %v529_v31, %v531_v32  ;;  %s963_s7 = smov [#allocation8]  }
  0x5a   : > { %p872_p8 = pnand %p871_p3, %p1194_p7  ;;  %s874_s30 = sshll.u32 %s963_s7, 4  ;;  %s875_s30 = int_to_ptr.vmem [resolvable:$false] %s874_s30 }
  0x5b   : > { %s876_s18 = scalar_lea.vmem %s875_s30, 64  ;;  %p877_p12 = scmp.lt.s32.totalorder %s565_s10, %s875_s30 }
  0x5c   : > { %p873_p9 = pneg %p872_p8  ;;  %p878_p13 = scmp.lt.s32.totalorder %s876_s18, %s870_s21 }
  0x5e   : > { %p879_p4 = por %p878_p13, %p877_p12 }
  0x60   : > { %p880_p2 = pnand %p879_p4, %p873_p9 }
 0x118   : > { %v336_v6 = vpop.f32.mrf.mxu0 }
 0x119   : > { %v343_v7 = vmul.f32 0.01, %v336_v6  ;;  %vm341_vm2 = vcmp.ge.f32.partialorder %v336_v6, 0.0 }
 0x11a   : > { %v338_v8 = vpop.f32.mrf.mxu0 }
 0x11b   : > { %vm342_vm1 = vcmp.ge.f32.partialorder %v338_v8, 0.0  ;;  %v344_v9 = vmul.f32 0.01, %v338_v8  ;;  %v345_v12 = vsel %vm341_vm2, %v336_v6, %v343_v7 }
 0x11d   : > { %v346_v10 = vsel %vm342_vm1, %v338_v8, %v344_v9 }
 0x11e   : > { %382 = vmatprep.subr.mxu1 %v346_v10 }
 0x11f   : > { %383 = vmatpush1.msra.mxu1 %v345_v12 }
 0x120   : > { %682 = vmatmul.mubr.msk.f32.vlgmr.msra.gmra.mxu1 %vm348_vm3, %v347_v11 }
 0x121   : > { %505 = vmatprep.mubr.f32.mxu1 %v961_v0 }
 0x1e0   : > { %v418_v13 = vpop.f32.mrf.mxu1 }
 0x1e1   : > { %v425_v14 = vmul.f32 0.01, %v418_v13  ;;  %vm423_vm4 = vcmp.ge.f32.partialorder %v418_v13, 0.0 }
 0x1e2   : > { %v420_v15 = vpop.f32.mrf.mxu1 }
 0x1e3   : > { %vm424_vm5 = vcmp.ge.f32.partialorder %v420_v15, 0.0  ;;  %v426_v16 = vmul.f32 0.01, %v420_v15  ;;  %v427_v19 = vsel %vm423_vm4, %v418_v13, %v425_v14 }
 0x1e5   : > { %v428_v17 = vsel %vm424_vm5, %v420_v15, %v426_v16 }
 0x1e6   : > { %683 = vmatprep.subr.msk.mxu1 %vm434_vm6, %v428_v17 }
 0x1e7   : > { %684 = vmatpush1.msk.msra.mxu1 %vm434_vm6, %v427_v19 }
 0x1e8   : > { %685 = vmatmul.mubr.msk.f32.vlgmr.msra.gmra.mxu1 %vm430_vm7, %v429_v18 }
 0x2a8   : > { %v507_v20 = vpop.f32.mrf.mxu1 }
 0x2a9   : > { %v686_v21 = vmul.f32 -1.442695, %v507_v20 }
 0x2aa   : > { %v509_v22 = vpop.f32.mrf.mxu1 }
 0x2ab   : > { %782 = vpow2.f32 %v686_v21  ;;  %v687_v23 = vmul.f32 -1.442695, %v509_v22 }
 0x2ad   : > { %784 = vpow2.f32 %v687_v23 }
 0x2b8   : > { %v783_v24 = vpop.eup %782 }
 0x2b9   : > { %v518_v25 = vadd.f32 1.0, %v783_v24 }
 0x2ba   : > { %v785_v26 = vpop.eup %784 }
 0x2bb   : > { %v519_v27 = vadd.f32 1.0, %v785_v26  ;;  %786 = vrcp.f32 %v518_v25 }
 0x2bd   : > { %788 = vrcp.f32 %v519_v27 }
 0x2c8   : > { %v787_v33 = vpop.eup %786 }
 0x2ca   : > { %v789_v35 = vpop.eup %788 }
 0x2cb   : > { %v526_v36 = vcombine.low %v787_v33, %v789_v35 }
 0x2cd   : > { %v533_v37 = vrot.slane %v526_v36, %v532_v34 }
 0x2cf   : > { %v540_v38 = vrot.slane %v533_v37, %v532_v34 }
 0x2d1   : > { %546 = vst.msk [vmem:[%s258_s9] sm:$0x3] %vm544_vm8, %v540_v38 }
 0x2d2   : > { %883 = shalt.err (!%p880_p2)
}
 0x2d3   : > { %s884_s23 = scalar_lea.hbm %s562_s13, 32  ;;  %s888_s2 = scalar_lea.hbm %s1171_s4, 64 }
 0x2d4   : > { %p885_p6 = scmp.ne.s32.totalorder %s562_s13, %s884_s23  ;;  %p889_p0 = scmp.lt.s32.totalorder %s562_s13, %s1171_s4 }
 0x2d5   : > { %p890_p10 = scmp.lt.s32.totalorder %s888_s2, %s884_s23 }
 0x2d6   : > { %p886_p11 = pnand %p885_p6, %p1194_p7 }
 0x2d7   : > { %p891_p5 = por %p890_p10, %p889_p0 }
 0x2d8   : > { %p887_p1 = pneg %p886_p11 }
 0x2da   : > { %p892_p3 = pnand %p891_p5, %p887_p1 }
 0x2dc   : > { %895 = shalt.err (!%p892_p3)
}
 0x2dd   : > { %705 = dma.vmem_to_hbm [thread:$0]  (%p1194_p7), %s565_s10, 32, %s562_s13, %s548_s8  }
 0x2de PF: > { %s576_s26 = sand.u32 1, %s934_s15   ;;  %p1195_p8 = scmp.ne.s32.totalorder %s1184_s28, 0 }
 0x2df   : > { %p1196_p9 = scmp.ge.s32.totalorder %s954_s20, 2  ;;  %s577_s29 = scalar_lea.sflag [#allocation4], %s576_s26 }
 0x2e1   : > { %p719_p12 = pnand %p1196_p9, %p1195_p8 }
 0x2e3   : > { %p720_p13 = pneg %p719_p12 }
 0x2e5   : > { %929 = dma.done.wait (%p720_p13), %s577_s29, 32  }
 0x2e6   : > { %931 = vsyncadd (%p720_p13), %s577_s29, 4294967264  ;;  %s21_s20 = sadd.s32 1, %s954_s20   ;;  %s1197_s15 = smov %s938_s16 }
 0x2e7   : > { %p18_p4 = scmp.ge.s32.totalorder %s21_s20, 4   ;;  %s1198_s16 = smov %s942_s17 }
 0x2e8   : > { %s1199_s17 = smov %s1102_s14  ;;  %s1200_s18 = smov %s950_s19 }
 0x2e9   : > { %s1201_s19 = smov %s1203_s22  ;;  %20 = sbr.rel (!%p18_p4) target bundleno = 10 (0xa), region = 89 }
 0x2ee   :  { %582 = vsyncpa [#allocation3], 1 }
 0x2ef   :  { %584 = vsyncpa [#allocation3 + $0x1], 1 }
 0x2f0   :  { %585 = vsyncpa [#allocation6], 1 }
 0x2f1   :  { %586 = vsyncpa [#allocation4], 1 }
 0x2f2   :  { %588 = vsyncpa [#allocation4 + $0x1], 1 }

</bundles_post_ra>
